<compile_context>
chip_gen: v5e
topology: v5e:2x2
jax: 0.10.0
libtpu: 0.0.40
codegen_flags: <defaults>
</compile_context>

<pallas_src>
import functools

import jax
import jax.numpy as jnp
from jax.experimental import pallas as pl
from jax.experimental.pallas import tpu as pltpu


def _round_up(x: int, m: int) -> int:
    return ((x + m - 1) // m) * m


def _generator_kernel(z_ref, w1_ref, b1_ref, w2_ref, b2_ref, o_ref):
    # z_ref : (TB, K)   noise tile (K tiny, e.g. 2; no K padding)
    # w1_ref: (K, Hp)   first Linear weight (in x out), resident across grid
    # b1_ref: (1, Hp)   first Linear bias, resident
    # w2_ref: (Hp, Op)  second Linear weight (in x out), resident
    # b2_ref: (1, Op)   second Linear bias, resident
    # o_ref : (TB, Op)  output tile (lane-dense, Op multiple of 128)
    z = z_ref[...].astype(jnp.float32)          # (TB, K)
    K = z_ref.shape[1]

    # First Linear on the VPU: K broadcast-FMAs (no MXU pass, no K padding).
    h = z[:, 0:1] * w1_ref[0:1, :]              # (TB,1)*(1,Hp) -> (TB,Hp)
    for k in range(1, K):
        h = h + z[:, k:k + 1] * w1_ref[k:k + 1, :]
    h = h + b1_ref[...]                         # broadcast (1,Hp) over rows
    h = jnp.maximum(h, 0.0)                     # ReLU

    # Second Linear on the MXU (Hp x Op contraction, f32 accumulation).
    out = jnp.dot(h, w2_ref[...], preferred_element_type=jnp.float32)
    o_ref[...] = (out + b2_ref[...]).astype(o_ref.dtype)


def prepare_generator_params(w1, b1, w2, b2):
    """Pad the Generator parameters to TPU-friendly shapes ONCE.

    Weights are stored as (in_features, out_features) so the kernel computes
    z @ W.  Only the hidden / output feature dims are padded to multiples of
    128; the tiny noise dim K is left unpadded (first layer runs on the VPU).
    Zero padding is semantics-preserving for Linear + ReLU + Linear.
    """
    K, H = w1.shape
    O = w2.shape[1]
    Hp = _round_up(max(H, 128), 128)
    Op = _round_up(max(O, 128), 128)

    w1_p = jnp.zeros((K, Hp), jnp.float32).at[:, :H].set(w1)
    b1_p = jnp.zeros((1, Hp), jnp.float32).at[0, :H].set(b1)
    w2_p = jnp.zeros((Hp, Op), jnp.float32).at[:H, :O].set(w2)
    b2_p = jnp.zeros((1, Op), jnp.float32).at[0, :O].set(b2)
    return w1_p, b1_p, w2_p, b2_p, O


@functools.partial(jax.jit, static_argnames=("out_dim",))
def generator_forward(z, w1_p, b1_p, w2_p, b2_p, *, out_dim):
    """z: (B, noise_dim) float32.  Params pre-padded via prepare_generator_params."""
    B, K = z.shape
    Hp = w1_p.shape[1]
    Op = w2_p.shape[1]

    # Batch tile: big (512 rows) when the batch is large so per-grid-step
    # overhead is amortized and both v7x TensorCores get work; otherwise a
    # single tile rounded up to the sublane multiple of 8.
    TB = 512 if B >= 512 else _round_up(max(B, 8), 8)
    Bp = _round_up(B, TB)

    # Only z ever needs per-call padding (rows only, and only if misaligned).
    if Bp != B:
        z_p = jnp.zeros((Bp, K), jnp.float32).at[:B, :].set(z)
    else:
        z_p = z.astype(jnp.float32)

    # TODO(synk): cast weights/activations to bf16 for MXU-bound (large-batch)
    # training on v6e/v7x; irrelevant at these shapes so kept f32 everywhere.
    out_p = pl.pallas_call(
        _generator_kernel,
        out_shape=jax.ShapeDtypeStruct((Bp, Op), jnp.float32),
        grid=(Bp // TB,),
        in_specs=[
            pl.BlockSpec((TB, K), lambda i: (i, 0)),    # z streamed over batch
            pl.BlockSpec((K, Hp), lambda i: (0, 0)),    # weights/biases resident
            pl.BlockSpec((1, Hp), lambda i: (0, 0)),
            pl.BlockSpec((Hp, Op), lambda i: (0, 0)),
            pl.BlockSpec((1, Op), lambda i: (0, 0)),
        ],
        out_specs=pl.BlockSpec((TB, Op), lambda i: (i, 0)),
        compiler_params=pltpu.CompilerParams(
            dimension_semantics=("parallel",),
        ),
    )(z_p, w1_p, b1_p, w2_p, b2_p)

    return out_p[:B, :out_dim]


def init_generator_params(key, noise_dim=2, output_dim=2, hidden_dim=100):
    """Deterministic init mimicking nn.Linear's U(-1/sqrt(fan_in), 1/sqrt(fan_in))."""
    k1, k2, k3, k4 = jax.random.split(key, 4)
    bound1 = 1.0 / jnp.sqrt(noise_dim)
    bound2 = 1.0 / jnp.sqrt(hidden_dim)
    # Stored as (in_features, out_features) so the kernel does z @ W.
    w1 = jax.random.uniform(k1, (noise_dim, hidden_dim), jnp.float32, -bound1, bound1)
    b1 = jax.random.uniform(k2, (hidden_dim,), jnp.float32, -bound1, bound1)
    w2 = jax.random.uniform(k3, (hidden_dim, output_dim), jnp.float32, -bound2, bound2)
    b2 = jax.random.uniform(k4, (output_dim,), jnp.float32, -bound2, bound2)
    return w1, b1, w2, b2


if __name__ == "__main__":
    noise_dim, output_dim, hidden_dim = 2, 2, 100
    batch = 8

    key = jax.random.PRNGKey(0)
    k_params, k_z = jax.random.split(key)
    w1, b1, w2, b2 = init_generator_params(
        k_params, noise_dim=noise_dim, output_dim=output_dim, hidden_dim=hidden_dim
    )
    z = jax.random.normal(k_z, (batch, noise_dim), jnp.float32)

    # Pad the parameters once (outside the per-call forward path).
    w1_p, b1_p, w2_p, b2_p, out_dim = prepare_generator_params(w1, b1, w2, b2)

    out = generator_forward(z, w1_p, b1_p, w2_p, b2_p, out_dim=out_dim)
    out = jax.block_until_ready(out)

    # Pure-JAX reference check of the forward semantics.
    ref = jnp.maximum(z @ w1 + b1, 0.0) @ w2 + b2
    assert out.shape == (batch, output_dim), out.shape
    assert jnp.allclose(out, ref, atol=1e-5, rtol=1e-5), "mismatch vs reference"

    print("KERNEL_OK")
</pallas_src>

<mosaic_0001>
module attributes {stable_mosaic.version = 11 : i64} {
  func.func @_generator_kernel(%arg0: i32, %arg1: memref<8x2xf32, #tpu.memory_space<vmem>>, %arg2: memref<2x128xf32, #tpu.memory_space<vmem>>, %arg3: memref<1x128xf32, #tpu.memory_space<vmem>>, %arg4: memref<128x128xf32, #tpu.memory_space<vmem>>, %arg5: memref<1x128xf32, #tpu.memory_space<vmem>>, %arg6: memref<8x128xf32, #tpu.memory_space<vmem>>) attributes {dimension_semantics = [#tpu.dimension_semantics<parallel>], iteration_bounds = array<i64: 1>, scalar_prefetch = 0 : i64, scratch_operands = 0 : i64, tpu.core_type = #tpu.core_type<tc>, window_params = [{transform_indices = @transform_0, window_bounds = array<i64: 8, 2>}, {pipeline_mode = #tpu.pipeline_mode<synchronous>, transform_indices = @transform_1, window_bounds = array<i64: 2, 128>}, {pipeline_mode = #tpu.pipeline_mode<synchronous>, transform_indices = @transform_2, window_bounds = array<i64: 1, 128>}, {pipeline_mode = #tpu.pipeline_mode<synchronous>, transform_indices = @transform_3, window_bounds = array<i64: 128, 128>}, {pipeline_mode = #tpu.pipeline_mode<synchronous>, transform_indices = @transform_4, window_bounds = array<i64: 1, 128>}, {transform_indices = @transform_5, window_bounds = array<i64: 8, 128>}]} {
    %c0 = arith.constant 0 : index
    %c0_0 = arith.constant 0 : index
    %0 = vector.load %arg1[%c0, %c0_0] : memref<8x2xf32, #tpu.memory_space<vmem>>, vector<8x2xf32>
    %1 = vector.extract_strided_slice %0 {offsets = [0, 0], sizes = [8, 1], strides = [1, 1]} : vector<8x2xf32> to vector<8x1xf32>
    %c0_1 = arith.constant 0 : index
    %c0_2 = arith.constant 0 : index
    %2 = vector.load %arg2[%c0_1, %c0_2] : memref<2x128xf32, #tpu.memory_space<vmem>>, vector<1x128xf32>
    %3 = vector.broadcast %1 : vector<8x1xf32> to vector<8x128xf32>
    %4 = vector.broadcast %2 : vector<1x128xf32> to vector<8x128xf32>
    %5 = arith.mulf %3, %4 : vector<8x128xf32>
    %6 = vector.extract_strided_slice %0 {offsets = [0, 1], sizes = [8, 1], strides = [1, 1]} : vector<8x2xf32> to vector<8x1xf32>
    %c1 = arith.constant 1 : index
    %c0_3 = arith.constant 0 : index
    %7 = vector.load %arg2[%c1, %c0_3] : memref<2x128xf32, #tpu.memory_space<vmem>>, vector<1x128xf32>
    %8 = vector.broadcast %6 : vector<8x1xf32> to vector<8x128xf32>
    %9 = vector.broadcast %7 : vector<1x128xf32> to vector<8x128xf32>
    %10 = arith.mulf %8, %9 : vector<8x128xf32>
    %11 = arith.addf %5, %10 : vector<8x128xf32>
    %c0_4 = arith.constant 0 : index
    %c0_5 = arith.constant 0 : index
    %12 = vector.load %arg3[%c0_4, %c0_5] : memref<1x128xf32, #tpu.memory_space<vmem>>, vector<1x128xf32>
    %13 = vector.broadcast %12 : vector<1x128xf32> to vector<8x128xf32>
    %14 = arith.addf %11, %13 : vector<8x128xf32>
    %cst = arith.constant 0.000000e+00 : f32
    %15 = vector.broadcast %cst : f32 to vector<8x128xf32>
    %16 = arith.maximumf %14, %15 : vector<8x128xf32>
    %c0_6 = arith.constant 0 : index
    %c0_7 = arith.constant 0 : index
    %17 = vector.load %arg4[%c0_6, %c0_7] : memref<128x128xf32, #tpu.memory_space<vmem>>, vector<128x128xf32>
    %cst_8 = arith.constant dense<0.000000e+00> : vector<8x128xf32>
    %18 = tpu.matmul %16, %17, %cst_8 {dimension_numbers = #tpu.dot_dimension_numbers<[1], [0], [0], [1], [0, 0, 1, 1], [], []>} : vector<8x128xf32>, vector<128x128xf32>, vector<8x128xf32> -> vector<8x128xf32>
    %c0_9 = arith.constant 0 : index
    %c0_10 = arith.constant 0 : index
    %19 = vector.load %arg5[%c0_9, %c0_10] : memref<1x128xf32, #tpu.memory_space<vmem>>, vector<1x128xf32>
    %20 = vector.broadcast %19 : vector<1x128xf32> to vector<8x128xf32>
    %21 = arith.addf %18, %20 : vector<8x128xf32>
    %c0_11 = arith.constant 0 : index
    %c0_12 = arith.constant 0 : index
    %22 = vector.load %arg6[%c0_11, %c0_12] : memref<8x128xf32, #tpu.memory_space<vmem>>, vector<8x128xf32>
    tpu.vector_store %arg6[%c0_11, %c0_12], %21 {strides = array<i32>} : memref<8x128xf32, #tpu.memory_space<vmem>>, vector<8x128xf32>,
    return
  }
  func.func @transform_0(%arg0: i32) -> (i32, i32) {
    %c0_i32 = arith.constant 0 : i32
    %c0_i32_0 = arith.constant 0 : i32
    return %arg0, %c0_i32 : i32, i32
  }
  func.func @transform_1(%arg0: i32) -> (i32, i32) {
    %c0_i32 = arith.constant 0 : i32
    %c0_i32_0 = arith.constant 0 : i32
    %c0_i32_1 = arith.constant 0 : i32
    return %c0_i32, %c0_i32_0 : i32, i32
  }
  func.func @transform_2(%arg0: i32) -> (i32, i32) {
    %c0_i32 = arith.constant 0 : i32
    %c0_i32_0 = arith.constant 0 : i32
    %c0_i32_1 = arith.constant 0 : i32
    return %c0_i32, %c0_i32_0 : i32, i32
  }
  func.func @transform_3(%arg0: i32) -> (i32, i32) {
    %c0_i32 = arith.constant 0 : i32
    %c0_i32_0 = arith.constant 0 : i32
    %c0_i32_1 = arith.constant 0 : i32
    return %c0_i32, %c0_i32_0 : i32, i32
  }
  func.func @transform_4(%arg0: i32) -> (i32, i32) {
    %c0_i32 = arith.constant 0 : i32
    %c0_i32_0 = arith.constant 0 : i32
    %c0_i32_1 = arith.constant 0 : i32
    return %c0_i32, %c0_i32_0 : i32, i32
  }
  func.func @transform_5(%arg0: i32) -> (i32, i32) {
    %c0_i32 = arith.constant 0 : i32
    %c0_i32_0 = arith.constant 0 : i32
    return %arg0, %c0_i32 : i32, i32
  }
}

</mosaic_0001>

<bundles_post_ra>
// kernel: generator_forward.1
= control target key start
LH: loop header
LB: loop body
LE: loop exit
PB: predicated region body
PF: predicated region fallthrough
CT: control target
= control target key end

     0   :  { %10 = vsyncpa [#allocation3], 0  ;;  %s142_s21 = smov [#allocation2]   ;;  %s143_s23 = smov 128   ;;  %s198_s0 = inlined_call_operand.vmem [shape: f32[8,2], index: 0, kind: input, shape index: {}]   ;;  %s199_s1 = inlined_call_operand.vmem [shape: f32[2,128], index: 1, kind: input, shape index: {}]   ;;  %s200_s2 = inlined_call_operand.vmem [shape: f32[1,128], index: 2, kind: input, shape index: {}]   ;;  %s201_s3 = inlined_call_operand.hbm [shape: f32[128,128], index: 3, kind: input, shape index: {}]   ;;  %s202_s4 = inlined_call_operand.vmem [shape: f32[1,128], index: 4, kind: input, shape index: {}]   ;;  %s203_s5 = inlined_call_operand.vmem [shape: f32[8,128], index: 5, kind: output, shape index: {}]  }
   0x1   :  { %s21_s20 = sshll.u32 %s201_s3, 4  ;;  %s23_s22 = sshll.u32 %s142_s21, 4  ;;  %s22_s20 = int_to_ptr.hbm [resolvable:$true] %s21_s20  ;;  %s24_s22 = int_to_ptr.vmem [resolvable:$true] %s23_s22 }
   0x2   :  { %s144_s24 = smov 8  }
   0x3   :  { %29 = dma.hbm_to_vmem [thread:$0]  %s22_s20, 2048, %s24_s22, [#allocation3], %s143_s23, %s143_s23, %s144_s24  }
   0x4   :  { %140 = dma.done.wait [#allocation3], 2048  }
   0x5   :  { %141 = vsyncadd [#allocation3], 4294965248  ;;  %v145_v0 = vmov 0   ;;  %v36_v1 = vld [vmem:[%s198_s0] sm:$0xff]  ;;  %v74_v2 = vld [vmem:[#allocation2 + $0x78] sm:$0xff]  ;;  %v146_v8 = vmov 1  }
   0x6   :  { %110 = vset.pattern.permute.xlu0 %v145_v0  ;;  %v73_v3 = vld [vmem:[#allocation2 + $0x70] sm:$0xff]  ;;  %79 = vmatpush.msra.mxu0 %v74_v2  ;;  %v72_v4 = vld [vmem:[#allocation2 + $0x68] sm:$0xff]  ;;  %v71_v5 = vld [vmem:[#allocation2 + $0x60] sm:$0xff] }
   0x7   :  { %40 = vperm.xlu0 %110, %v36_v1   ;;  %v70_v6 = vld [vmem:[#allocation2 + $0x58] sm:$0xff]  ;;  %v69_v7 = vld [vmem:[#allocation2 + $0x50] sm:$0xff]  ;;  %v68_v9 = vld [vmem:[#allocation2 + $0x48] sm:$0xff] }
   0x8   :  { %80 = vmatpush.msra.mxu0 %v73_v3  ;;  %v67_v10 = vld [vmem:[#allocation2 + $0x40] sm:$0xff]  ;;  %v66_v11 = vld [vmem:[#allocation2 + $0x38] sm:$0xff]  ;;  %v65_v12 = vld [vmem:[#allocation2 + $0x30] sm:$0xff] }
   0x9   :  { %v64_v13 = vld [vmem:[#allocation2 + $0x28] sm:$0xff]  ;;  %v63_v14 = vld [vmem:[#allocation2 + $0x20] sm:$0xff]  ;;  %v62_v15 = vld [vmem:[#allocation2 + $0x18] sm:$0xff] }
   0xa   :  { %81 = vmatpush.msra.mxu0 %v72_v4  ;;  %v61_v16 = vld [vmem:[#allocation2 + $0x10] sm:$0xff]  ;;  %v60_v17 = vld [vmem:[#allocation2 + $0x8] sm:$0xff]  ;;  %v59_v18 = vld [vmem:[#allocation2] sm:$0xff] }
   0xb   :  { %v112_v20 = vld [vmem:[%s199_s1] ss:$0 sm:$0xff]  ;;  %v113_v21 = vld [vmem:[%s199_s1 + $0x1] ss:$0 sm:$0xff] }
   0xc   :  { %82 = vmatpush.msra.mxu0 %v71_v5  ;;  %v114_v25 = vld [vmem:[%s200_s2] ss:$0 sm:$0xff] }
   0xd   :  { %v115_v29 = vld [vmem:[%s202_s4] ss:$0 sm:$0xff] }
   0xe   :  { %83 = vmatpush.msra.mxu0 %v70_v6 }
   0xf   :  { %111 = vset.pattern.permute.xlu0 %v146_v8 }
  0x10   :  { %47 = vperm.xlu0 %111, %v36_v1   ;;  %84 = vmatpush.msra.mxu0 %v69_v7 }
  0x12   :  { %85 = vmatpush.msra.mxu0 %v68_v9 }
  0x14   :  { %86 = vmatpush.msra.mxu0 %v67_v10 }
  0x16   :  { %87 = vmatpush.msra.mxu0 %v66_v11 }
  0x18   :  { %88 = vmatpush.msra.mxu0 %v65_v12 }
  0x1a   :  { %89 = vmatpush.msra.mxu0 %v64_v13 }
  0x1c   :  { %90 = vmatpush.msra.mxu0 %v63_v14 }
  0x1e   :  { %91 = vmatpush.msra.mxu0 %v62_v15 }
  0x20   :  { %92 = vmatpush.msra.mxu0 %v61_v16 }
  0x22   :  { %93 = vmatpush.msra.mxu0 %v60_v17 }
  0x24   :  { %94 = vmatpush.msra.mxu0 %v59_v18 }
  0x79   :  { %v41_v19 = vpop.permute.xlu0 %40 }
  0x7a   :  { %v44_v23 = vmul.f32 %v112_v20, %v41_v19 }
  0x82   :  { %v48_v22 = vpop.permute.xlu0 %47 }
  0x83   :  { %v51_v24 = vmul.f32 %v113_v21, %v48_v22 }
  0x85   :  { %v52_v26 = vadd.f32 %v51_v24, %v44_v23 }
  0x87   :  { %v57_v27 = vadd.f32 %v114_v25, %v52_v26 }
  0x89   :  { %v58_v28 = vmax.f32 %v57_v27, 0.0 }
  0x8b   :  { %95 = vmatmul.f32.vlgmr.msra.gmra.mxu0 %v58_v28 }
 0x108   :  { %v96_v30 = vpop.f32.mrf.mxu0 }
 0x109   :  { %v97_v31 = vadd.f32 %v115_v29, %v96_v30 }
 0x10b   :  { %99 = vst [vmem:[%s203_s5] sm:$0xff] %v97_v31 }
 0x10c   :  { %104 = vsyncpa [#allocation3], 1 }

</bundles_post_ra>
